<compile_context>
chip_gen: v6e
topology: v6e:2x2x1
jax: 0.10.0
libtpu: 0.0.40
codegen_flags: <defaults>
</compile_context>

<pallas_src>
import functools

import jax
import jax.numpy as jnp
from jax.experimental import pallas as pl
from jax.experimental.pallas import tpu as pltpu


def _fused_kernel(x_ref, y_ref, w1_ref, w2_ref, bias_ref, o_ref, a_scr,
                  *, w_lo, fh, th_lo):
    """One row tile of fused upsample + conv1x1 + BN + add.

    x_ref : (th_lo * w_lo,      C1)       low-res x rows
    y_ref : (th_lo * fh * w_lo, fw*C2)    full-res y rows (lanes = (q, C2))
    w1_ref: (C1,     fw*Cout)             BN-folded, W-replicated conv1 weight
    w2_ref: (fw*C2,  fw*Cout)             BN-folded, block-diagonal conv2 weight
    bias  : (1, fw*Cout)                  b1 + b2, replicated over q
    o_ref : (th_lo * fh * w_lo, fw*Cout)  output rows
    a_scr : (th_lo * w_lo, fw*Cout) f32   x-branch result at low resolution
    """
    # x branch at low resolution (W replication already baked into w1_ref).
    a_scr[...] = jnp.dot(x_ref[...], w1_ref[...],
                         preferred_element_type=jnp.float32)
    # y branch at full resolution + bias, stored straight into the output tile.
    o_ref[...] = (jnp.dot(y_ref[...], w2_ref[...],
                          preferred_element_type=jnp.float32)
                  + bias_ref[...]).astype(o_ref.dtype)
    # H-direction nearest replication of the x branch: every group of w_lo
    # low-res rows is repeated fh times (sublane concat) and accumulated into
    # the matching fh*w_lo output rows.  th_lo is small -> static unroll.
    chunk = fh * w_lo
    for t in range(th_lo):
        a_t = a_scr[t * w_lo:(t + 1) * w_lo, :]
        a_rep = a_t if fh == 1 else jnp.concatenate([a_t] * fh, axis=0)
        o_ref[t * chunk:(t + 1) * chunk, :] += a_rep.astype(o_ref.dtype)


def _pick_th_lo(rows_lo, w_lo, fh, c1, kin, kout, in_bytes,
                target_rows=2048, max_unroll=32,
                vmem_budget=12 * 1024 * 1024):
    """Pick how many low-res H rows one grid step handles."""
    def vmem_bytes(d):
        tmx, tm = d * w_lo, d * fh * w_lo
        return (2 * (tmx * c1 + tm * kin) * in_bytes   # double-buffered inputs
                + 2 * tm * kout * 4                    # double-buffered output
                + tmx * kout * 4)                      # x-branch scratch

    divisors = [d for d in range(1, rows_lo + 1) if rows_lo % d == 0]
    # Layout feasibility: block sublane dims must be multiples of 8 or full.
    feasible = [d for d in divisors if (d * w_lo) % 8 == 0 or d == rows_lo]
    usable = [d for d in feasible
              if d <= max_unroll and vmem_bytes(d) <= vmem_budget]
    if not usable:
        return min(feasible)
    # Prefer big tiles (amortize per-grid-step overhead) but keep >= 2 blocks
    # so megacore / v7x's two TensorCores are not idled when possible.
    pref = [d for d in usable
            if d * fh * w_lo <= target_rows and rows_lo // d >= 2]
    if pref:
        return max(pref)
    pref = [d for d in usable if d * fh * w_lo <= target_rows]
    if pref:
        return max(pref)
    return min(usable)


def block_upsample_add_nhwc(x, y, params, *, compute_dtype=jnp.float32):
    """x: (N, h, w, C1) NHWC; y: (N, H, W, C2) NHWC -> (N, H, W, Cout) f32."""
    w1, w2, s1, b1, s2, b2 = params
    N, h, w_lo, C1 = x.shape
    Ny, H, W, C2 = y.shape
    assert Ny == N
    Cout = w1.shape[1]
    assert w1.shape == (C1, Cout) and w2.shape == (C2, Cout)
    # TODO(synk): non-integer nearest scale factors (H % h or W % w != 0) are
    # not supported by the fused path (YOLO upsample is always integer); they
    # would need a scalar-prefetched row-index gather instead.
    assert H % h == 0 and W % w_lo == 0, "integer upsample factors required"
    fh, fw = H // h, W // w_lo

    # ---- host-side folding: BN (eval) + nearest W-replication -> weights ----
    w1f = (w1 * s1.reshape(1, Cout)).astype(compute_dtype)       # (C1, Cout)
    w2f = (w2 * s2.reshape(1, Cout)).astype(compute_dtype)       # (C2, Cout)
    w1rep = jnp.tile(w1f, (1, fw))                               # (C1, fw*Cout)
    w2blk = jnp.kron(jnp.eye(fw, dtype=compute_dtype), w2f)      # (fw*C2, fw*Cout)
    bias = jnp.tile((b1 + b2).reshape(1, Cout), (1, fw)).astype(jnp.float32)

    # ---- zero-copy 2D views: rows = (n, H_row, w_col), lanes = (q, C) ----
    x2 = x.reshape(N * h * w_lo, C1).astype(compute_dtype)
    y2 = y.reshape(N * H * w_lo, fw * C2).astype(compute_dtype)

    in_bytes = jnp.dtype(compute_dtype).itemsize
    Kin, Kout = fw * C2, fw * Cout
    rows_lo = N * h                       # grid unit = one low-res H row
    th_lo = _pick_th_lo(rows_lo, w_lo, fh, C1, Kin, Kout, in_bytes)
    grid = (rows_lo // th_lo,)
    tmx, tm = th_lo * w_lo, th_lo * fh * w_lo

    kernel = functools.partial(_fused_kernel, w_lo=w_lo, fh=fh, th_lo=th_lo)
    flops = 2 * (x2.shape[0] * C1 * Kout + y2.shape[0] * Kin * Kout)
    bytes_accessed = (x2.size * in_bytes + y2.size * in_bytes
                      + (w1rep.size + w2blk.size) * in_bytes
                      + bias.size * 4 + N * H * w_lo * Kout * 4)

    out2 = pl.pallas_call(
        kernel,
        out_shape=jax.ShapeDtypeStruct((N * H * w_lo, Kout), jnp.float32),
        grid_spec=pltpu.PrefetchScalarGridSpec(
            num_scalar_prefetch=0,
            grid=grid,
            in_specs=[
                pl.BlockSpec((tmx, C1), lambda i: (i, 0)),     # low-res x rows
                pl.BlockSpec((tm, Kin), lambda i: (i, 0)),     # y rows
                pl.BlockSpec((C1, Kout), lambda i: (0, 0)),    # folded conv1 w
                pl.BlockSpec((Kin, Kout), lambda i: (0, 0)),   # folded conv2 w
                pl.BlockSpec((1, Kout), lambda i: (0, 0)),     # bias
            ],
            out_specs=pl.BlockSpec((tm, Kout), lambda i: (i, 0)),
            scratch_shapes=[pltpu.VMEM((tmx, Kout), jnp.float32)],
        ),
        compiler_params=pltpu.CompilerParams(
            dimension_semantics=("parallel",),
            vmem_limit_bytes=32 * 1024 * 1024),
        cost_estimate=pl.CostEstimate(flops=int(flops), transcendentals=0,
                                      bytes_accessed=int(bytes_accessed)),
    )(x2, y2, w1rep, w2blk, bias)

    return out2.reshape(N, H, W, Cout)


def block_upsample_add(x_nchw, y_nchw, params, *, compute_dtype=jnp.float32):
    """Drop-in NCHW interface matching the PyTorch module.

    The transposes here are adapter glue for the NCHW test harness; in an
    NHWC end-to-end model they disappear and the Pallas path is transpose-free.
    """
    x = jnp.transpose(x_nchw, (0, 2, 3, 1))
    y = jnp.transpose(y_nchw, (0, 2, 3, 1))
    out = block_upsample_add_nhwc(x, y, params, compute_dtype=compute_dtype)
    return jnp.transpose(out, (0, 3, 1, 2))


def make_params(key, c1, c2, cout, eps=1e-5):
    ks = jax.random.split(key, 10)
    # conv weights: PyTorch Conv2d weight is (Cout, Cin, 1, 1); stored (Cin, Cout)
    w1 = jax.random.normal(ks[0], (c1, cout), jnp.float32) * 0.1
    w2 = jax.random.normal(ks[1], (c2, cout), jnp.float32) * 0.1
    # BatchNorm (eval mode): gamma, beta, running_mean, running_var
    g1 = 1.0 + 0.1 * jax.random.normal(ks[2], (cout,), jnp.float32)
    be1 = 0.1 * jax.random.normal(ks[3], (cout,), jnp.float32)
    m1 = 0.1 * jax.random.normal(ks[4], (cout,), jnp.float32)
    v1 = jnp.abs(jax.random.normal(ks[5], (cout,), jnp.float32)) + 0.5
    g2 = 1.0 + 0.1 * jax.random.normal(ks[6], (cout,), jnp.float32)
    be2 = 0.1 * jax.random.normal(ks[7], (cout,), jnp.float32)
    m2 = 0.1 * jax.random.normal(ks[8], (cout,), jnp.float32)
    v2 = jnp.abs(jax.random.normal(ks[9], (cout,), jnp.float32)) + 0.5
    # fold BN into scale/bias: y = x*scale + bias
    s1 = g1 / jnp.sqrt(v1 + eps)
    b1 = be1 - m1 * s1
    s2 = g2 / jnp.sqrt(v2 + eps)
    b2 = be2 - m2 * s2
    # TODO(synk): BatchNorm is modeled in eval mode only (running stats folded
    # into scale/bias); training-mode batch statistics are not modeled.
    return (w1, w2, s1, b1, s2, b2)


def reference(x, y, params):
    """Pure-JAX reference mirroring the PyTorch eval-mode forward (NCHW)."""
    w1, w2, s1, b1, s2, b2 = params
    _, _, h, w = x.shape
    _, _, H, W = y.shape
    ridx = (jnp.arange(H) * h) // H
    cidx = (jnp.arange(W) * w) // W
    x_up = x[:, :, ridx, :][:, :, :, cidx]
    hp = jax.lax.Precision.HIGHEST
    xb = jnp.einsum('nchw,cd->ndhw', x_up, w1, precision=hp)
    xb = xb * s1.reshape(1, -1, 1, 1) + b1.reshape(1, -1, 1, 1)
    yb = jnp.einsum('nchw,cd->ndhw', y, w2, precision=hp)
    yb = yb * s2.reshape(1, -1, 1, 1) + b2.reshape(1, -1, 1, 1)
    return xb + yb


if __name__ == "__main__":
    key = jax.random.PRNGKey(0)
    kx, ky, kp = jax.random.split(key, 3)

    N, C1, C2, Cout = 2, 8, 4, 4
    h, w = 8, 8            # x spatial (low-res)
    H, W = 16, 16          # y spatial (target, 2x nearest upsample)

    x = jax.random.normal(kx, (N, C1, h, w), jnp.float32)   # NCHW like PyTorch
    y = jax.random.normal(ky, (N, C2, H, W), jnp.float32)
    params = make_params(kp, C1, C2, Cout)

    ref = reference(x, y, params)

    # f32 path
    out = jax.block_until_ready(block_upsample_add(x, y, params))
    assert out.shape == (N, Cout, H, W)
    assert jnp.allclose(out, ref, atol=5e-3, rtol=5e-3), "f32 mismatch vs reference"

    # bf16 I/O path (halves HBM traffic; f32 accumulation kept)
    out_bf16 = jax.block_until_ready(
        block_upsample_add(x, y, params, compute_dtype=jnp.bfloat16))
    assert jnp.allclose(out_bf16, ref, atol=5e-2, rtol=5e-2), "bf16 mismatch vs reference"

    print("KERNEL_OK")
</pallas_src>

<mosaic_0001>
module attributes {stable_mosaic.version = 11 : i64} {
  func.func @_fused_kernel(%arg0: i32, %arg1: memref<64x8xf32, #tpu.memory_space<vmem>>, %arg2: memref<128x8xf32, #tpu.memory_space<vmem>>, %arg3: memref<8x8xf32, #tpu.memory_space<vmem>>, %arg4: memref<8x8xf32, #tpu.memory_space<vmem>>, %arg5: memref<1x8xf32, #tpu.memory_space<vmem>>, %arg6: memref<128x8xf32, #tpu.memory_space<vmem>>, %arg7: memref<64x8xf32, #tpu.memory_space<vmem>>) attributes {dimension_semantics = [#tpu.dimension_semantics<parallel>], iteration_bounds = array<i64: 2>, scalar_prefetch = 0 : i64, scratch_operands = 1 : i64, tpu.core_type = #tpu.core_type<tc>, window_params = [{transform_indices = @transform_0, window_bounds = array<i64: 64, 8>}, {transform_indices = @transform_1, window_bounds = array<i64: 128, 8>}, {pipeline_mode = #tpu.pipeline_mode<synchronous>, transform_indices = @transform_2, window_bounds = array<i64: 8, 8>}, {pipeline_mode = #tpu.pipeline_mode<synchronous>, transform_indices = @transform_3, window_bounds = array<i64: 8, 8>}, {pipeline_mode = #tpu.pipeline_mode<synchronous>, transform_indices = @transform_4, window_bounds = array<i64: 1, 8>}, {transform_indices = @transform_5, window_bounds = array<i64: 128, 8>}]} {
    %c0 = arith.constant 0 : index
    %c0_0 = arith.constant 0 : index
    %0 = vector.load %arg1[%c0, %c0_0] : memref<64x8xf32, #tpu.memory_space<vmem>>, vector<64x8xf32>
    %c0_1 = arith.constant 0 : index
    %c0_2 = arith.constant 0 : index
    %1 = vector.load %arg3[%c0_1, %c0_2] : memref<8x8xf32, #tpu.memory_space<vmem>>, vector<8x8xf32>
    %cst = arith.constant dense<0.000000e+00> : vector<64x8xf32>
    %2 = tpu.matmul %0, %1, %cst {dimension_numbers = #tpu.dot_dimension_numbers<[1], [0], [0], [1], [0, 0, 1, 1], [], []>} : vector<64x8xf32>, vector<8x8xf32>, vector<64x8xf32> -> vector<64x8xf32>
    %c0_3 = arith.constant 0 : index
    %c0_4 = arith.constant 0 : index
    %3 = vector.load %arg7[%c0_3, %c0_4] : memref<64x8xf32, #tpu.memory_space<vmem>>, vector<64x8xf32>
    tpu.vector_store %arg7[%c0_3, %c0_4], %2 {strides = array<i32>} : memref<64x8xf32, #tpu.memory_space<vmem>>, vector<64x8xf32>,
    %c0_5 = arith.constant 0 : index
    %c0_6 = arith.constant 0 : index
    %4 = vector.load %arg2[%c0_5, %c0_6] : memref<128x8xf32, #tpu.memory_space<vmem>>, vector<128x8xf32>
    %c0_7 = arith.constant 0 : index
    %c0_8 = arith.constant 0 : index
    %5 = vector.load %arg4[%c0_7, %c0_8] : memref<8x8xf32, #tpu.memory_space<vmem>>, vector<8x8xf32>
    %cst_9 = arith.constant dense<0.000000e+00> : vector<128x8xf32>
    %6 = tpu.matmul %4, %5, %cst_9 {dimension_numbers = #tpu.dot_dimension_numbers<[1], [0], [0], [1], [0, 0, 1, 1], [], []>} : vector<128x8xf32>, vector<8x8xf32>, vector<128x8xf32> -> vector<128x8xf32>
    %c0_10 = arith.constant 0 : index
    %c0_11 = arith.constant 0 : index
    %7 = vector.load %arg5[%c0_10, %c0_11] : memref<1x8xf32, #tpu.memory_space<vmem>>, vector<1x8xf32>
    %8 = vector.broadcast %7 : vector<1x8xf32> to vector<128x8xf32>
    %9 = arith.addf %6, %8 : vector<128x8xf32>
    %c0_12 = arith.constant 0 : index
    %c0_13 = arith.constant 0 : index
    %10 = vector.load %arg6[%c0_12, %c0_13] : memref<128x8xf32, #tpu.memory_space<vmem>>, vector<128x8xf32>
    tpu.vector_store %arg6[%c0_12, %c0_13], %9 {strides = array<i32>} : memref<128x8xf32, #tpu.memory_space<vmem>>, vector<128x8xf32>,
    %c0_14 = arith.constant 0 : index
    %c0_15 = arith.constant 0 : index
    %11 = vector.load %arg7[%c0_14, %c0_15] : memref<64x8xf32, #tpu.memory_space<vmem>>, vector<8x8xf32>
    %12 = tpu.concatenate %11, %11 in 0 : vector<8x8xf32>, vector<8x8xf32> -> vector<16x8xf32>
    %c0_16 = arith.constant 0 : index
    %c0_17 = arith.constant 0 : index
    %13 = vector.load %arg6[%c0_16, %c0_17] : memref<128x8xf32, #tpu.memory_space<vmem>>, vector<16x8xf32>
    %14 = arith.addf %13, %12 : vector<16x8xf32>
    %c0_18 = arith.constant 0 : index
    %c0_19 = arith.constant 0 : index
    %15 = vector.load %arg6[%c0_18, %c0_19] : memref<128x8xf32, #tpu.memory_space<vmem>>, vector<16x8xf32>
    tpu.vector_store %arg6[%c0_18, %c0_19], %14 {strides = array<i32>} : memref<128x8xf32, #tpu.memory_space<vmem>>, vector<16x8xf32>,
    %c8 = arith.constant 8 : index
    %c0_20 = arith.constant 0 : index
    %16 = vector.load %arg7[%c8, %c0_20] : memref<64x8xf32, #tpu.memory_space<vmem>>, vector<8x8xf32>
    %17 = tpu.concatenate %16, %16 in 0 : vector<8x8xf32>, vector<8x8xf32> -> vector<16x8xf32>
    %c16 = arith.constant 16 : index
    %c0_21 = arith.constant 0 : index
    %18 = vector.load %arg6[%c16, %c0_21] : memref<128x8xf32, #tpu.memory_space<vmem>>, vector<16x8xf32>
    %19 = arith.addf %18, %17 : vector<16x8xf32>
    %c16_22 = arith.constant 16 : index
    %c0_23 = arith.constant 0 : index
    %20 = vector.load %arg6[%c16_22, %c0_23] : memref<128x8xf32, #tpu.memory_space<vmem>>, vector<16x8xf32>
    tpu.vector_store %arg6[%c16_22, %c0_23], %19 {strides = array<i32>} : memref<128x8xf32, #tpu.memory_space<vmem>>, vector<16x8xf32>,
    %c16_24 = arith.constant 16 : index
    %c0_25 = arith.constant 0 : index
    %21 = vector.load %arg7[%c16_24, %c0_25] : memref<64x8xf32, #tpu.memory_space<vmem>>, vector<8x8xf32>
    %22 = tpu.concatenate %21, %21 in 0 : vector<8x8xf32>, vector<8x8xf32> -> vector<16x8xf32>
    %c32 = arith.constant 32 : index
    %c0_26 = arith.constant 0 : index
    %23 = vector.load %arg6[%c32, %c0_26] : memref<128x8xf32, #tpu.memory_space<vmem>>, vector<16x8xf32>
    %24 = arith.addf %23, %22 : vector<16x8xf32>
    %c32_27 = arith.constant 32 : index
    %c0_28 = arith.constant 0 : index
    %25 = vector.load %arg6[%c32_27, %c0_28] : memref<128x8xf32, #tpu.memory_space<vmem>>, vector<16x8xf32>
    tpu.vector_store %arg6[%c32_27, %c0_28], %24 {strides = array<i32>} : memref<128x8xf32, #tpu.memory_space<vmem>>, vector<16x8xf32>,
    %c24 = arith.constant 24 : index
    %c0_29 = arith.constant 0 : index
    %26 = vector.load %arg7[%c24, %c0_29] : memref<64x8xf32, #tpu.memory_space<vmem>>, vector<8x8xf32>
    %27 = tpu.concatenate %26, %26 in 0 : vector<8x8xf32>, vector<8x8xf32> -> vector<16x8xf32>
    %c48 = arith.constant 48 : index
    %c0_30 = arith.constant 0 : index
    %28 = vector.load %arg6[%c48, %c0_30] : memref<128x8xf32, #tpu.memory_space<vmem>>, vector<16x8xf32>
    %29 = arith.addf %28, %27 : vector<16x8xf32>
    %c48_31 = arith.constant 48 : index
    %c0_32 = arith.constant 0 : index
    %30 = vector.load %arg6[%c48_31, %c0_32] : memref<128x8xf32, #tpu.memory_space<vmem>>, vector<16x8xf32>
    tpu.vector_store %arg6[%c48_31, %c0_32], %29 {strides = array<i32>} : memref<128x8xf32, #tpu.memory_space<vmem>>, vector<16x8xf32>,
    %c32_33 = arith.constant 32 : index
    %c0_34 = arith.constant 0 : index
    %31 = vector.load %arg7[%c32_33, %c0_34] : memref<64x8xf32, #tpu.memory_space<vmem>>, vector<8x8xf32>
    %32 = tpu.concatenate %31, %31 in 0 : vector<8x8xf32>, vector<8x8xf32> -> vector<16x8xf32>
    %c64 = arith.constant 64 : index
    %c0_35 = arith.constant 0 : index
    %33 = vector.load %arg6[%c64, %c0_35] : memref<128x8xf32, #tpu.memory_space<vmem>>, vector<16x8xf32>
    %34 = arith.addf %33, %32 : vector<16x8xf32>
    %c64_36 = arith.constant 64 : index
    %c0_37 = arith.constant 0 : index
    %35 = vector.load %arg6[%c64_36, %c0_37] : memref<128x8xf32, #tpu.memory_space<vmem>>, vector<16x8xf32>
    tpu.vector_store %arg6[%c64_36, %c0_37], %34 {strides = array<i32>} : memref<128x8xf32, #tpu.memory_space<vmem>>, vector<16x8xf32>,
    %c40 = arith.constant 40 : index
    %c0_38 = arith.constant 0 : index
    %36 = vector.load %arg7[%c40, %c0_38] : memref<64x8xf32, #tpu.memory_space<vmem>>, vector<8x8xf32>
    %37 = tpu.concatenate %36, %36 in 0 : vector<8x8xf32>, vector<8x8xf32> -> vector<16x8xf32>
    %c80 = arith.constant 80 : index
    %c0_39 = arith.constant 0 : index
    %38 = vector.load %arg6[%c80, %c0_39] : memref<128x8xf32, #tpu.memory_space<vmem>>, vector<16x8xf32>
    %39 = arith.addf %38, %37 : vector<16x8xf32>
    %c80_40 = arith.constant 80 : index
    %c0_41 = arith.constant 0 : index
    %40 = vector.load %arg6[%c80_40, %c0_41] : memref<128x8xf32, #tpu.memory_space<vmem>>, vector<16x8xf32>
    tpu.vector_store %arg6[%c80_40, %c0_41], %39 {strides = array<i32>} : memref<128x8xf32, #tpu.memory_space<vmem>>, vector<16x8xf32>,
    %c48_42 = arith.constant 48 : index
    %c0_43 = arith.constant 0 : index
    %41 = vector.load %arg7[%c48_42, %c0_43] : memref<64x8xf32, #tpu.memory_space<vmem>>, vector<8x8xf32>
    %42 = tpu.concatenate %41, %41 in 0 : vector<8x8xf32>, vector<8x8xf32> -> vector<16x8xf32>
    %c96 = arith.constant 96 : index
    %c0_44 = arith.constant 0 : index
    %43 = vector.load %arg6[%c96, %c0_44] : memref<128x8xf32, #tpu.memory_space<vmem>>, vector<16x8xf32>
    %44 = arith.addf %43, %42 : vector<16x8xf32>
    %c96_45 = arith.constant 96 : index
    %c0_46 = arith.constant 0 : index
    %45 = vector.load %arg6[%c96_45, %c0_46] : memref<128x8xf32, #tpu.memory_space<vmem>>, vector<16x8xf32>
    tpu.vector_store %arg6[%c96_45, %c0_46], %44 {strides = array<i32>} : memref<128x8xf32, #tpu.memory_space<vmem>>, vector<16x8xf32>,
    %c56 = arith.constant 56 : index
    %c0_47 = arith.constant 0 : index
    %46 = vector.load %arg7[%c56, %c0_47] : memref<64x8xf32, #tpu.memory_space<vmem>>, vector<8x8xf32>
    %47 = tpu.concatenate %46, %46 in 0 : vector<8x8xf32>, vector<8x8xf32> -> vector<16x8xf32>
    %c112 = arith.constant 112 : index
    %c0_48 = arith.constant 0 : index
    %48 = vector.load %arg6[%c112, %c0_48] : memref<128x8xf32, #tpu.memory_space<vmem>>, vector<16x8xf32>
    %49 = arith.addf %48, %47 : vector<16x8xf32>
    %c112_49 = arith.constant 112 : index
    %c0_50 = arith.constant 0 : index
    %50 = vector.load %arg6[%c112_49, %c0_50] : memref<128x8xf32, #tpu.memory_space<vmem>>, vector<16x8xf32>
    tpu.vector_store %arg6[%c112_49, %c0_50], %49 {strides = array<i32>} : memref<128x8xf32, #tpu.memory_space<vmem>>, vector<16x8xf32>,
    return
  }
  func.func @transform_0(%arg0: i32) -> (i32, i32) {
    %c0_i32 = arith.constant 0 : i32
    %c0_i32_0 = arith.constant 0 : i32
    return %arg0, %c0_i32 : i32, i32
  }
  func.func @transform_1(%arg0: i32) -> (i32, i32) {
    %c0_i32 = arith.constant 0 : i32
    %c0_i32_0 = arith.constant 0 : i32
    return %arg0, %c0_i32 : i32, i32
  }
  func.func @transform_2(%arg0: i32) -> (i32, i32) {
    %c0_i32 = arith.constant 0 : i32
    %c0_i32_0 = arith.constant 0 : i32
    %c0_i32_1 = arith.constant 0 : i32
    return %c0_i32, %c0_i32_0 : i32, i32
  }
  func.func @transform_3(%arg0: i32) -> (i32, i32) {
    %c0_i32 = arith.constant 0 : i32
    %c0_i32_0 = arith.constant 0 : i32
    %c0_i32_1 = arith.constant 0 : i32
    return %c0_i32, %c0_i32_0 : i32, i32
  }
  func.func @transform_4(%arg0: i32) -> (i32, i32) {
    %c0_i32 = arith.constant 0 : i32
    %c0_i32_0 = arith.constant 0 : i32
    %c0_i32_1 = arith.constant 0 : i32
    return %c0_i32, %c0_i32_0 : i32, i32
  }
  func.func @transform_5(%arg0: i32) -> (i32, i32) {
    %c0_i32 = arith.constant 0 : i32
    %c0_i32_0 = arith.constant 0 : i32
    return %arg0, %c0_i32 : i32, i32
  }
}

</mosaic_0001>

<bundles_post_ra>
// kernel: tpu_custom_call.1
= control target key start
LH: loop header
LB: loop body
LE: loop exit
PB: predicated region body
PF: predicated region fallthrough
CT: control target
= control target key end

     0   :  { %s906_s18 = smov 0   ;;  %s1102_s0 = inlined_call_operand.vmem [shape: f32[128,8], index: 0, kind: input, shape index: {}]   ;;  %s1103_s1 = inlined_call_operand.vmem [shape: f32[256,8], index: 1, kind: input, shape index: {}]   ;;  %s1104_s2 = inlined_call_operand.vmem [shape: f32[8,8], index: 2, kind: input, shape index: {}]   ;;  %s1105_s3 = inlined_call_operand.vmem [shape: f32[8,8], index: 3, kind: input, shape index: {}]   ;;  %s1106_s4 = inlined_call_operand.vmem [shape: f32[1,8], index: 4, kind: input, shape index: {}]   ;;  %s1107_s5 = inlined_call_operand.vmem [shape: f32[256,8], index: 5, kind: output, shape index: {}]  }
   0x1 LB: > { %s754_s19 = sadd.s32 4294967295, %s874_s18   ;;  %p758_p0 = scmp.ge.s32.totalorder %s874_s18, 1  ;;  %s874_s18 = sphi %s906_s18, %s15_s18  }
   0x2   : > { %p199_p1 = scmp.lt.s32.totalorder %s874_s18, 3 }
   0x4   : > { %p200_p2 = pnand %p758_p0, %p199_p1 }
   0x5   : > { %s759_s24 = sshll.u32 (!%p200_p2), %s754_s19, 3  ;;  %s761_s25 = sshll.u32 (!%p200_p2), %s754_s19, 4 }
   0x6   : > { %203 = sbr.rel (%p200_p2) target bundleno = 245 (0xf5), region = 40  ;;  %p233_p3 = scmp.lt.s32.totalorder (!%p200_p2), %s759_s24, 15 }
   0x7   : > { %p239_p4 = scmp.lt.s32.totalorder (!%p200_p2), %s761_s25, 31 }
   0xb   : > { %v258_v0 = vld [vmem:[%s1104_s2] sm:$0xff]  ;;  %s1109_s24 = smov (!%p233_p3, %s759_s24), 15  ;;  %s1111_s25 = smov (!%p239_p4, %s761_s25), 31  ;;  %vm259_vm0 = vcmask 64512  }
   0xc   : > { %v413_v1 = vld [vmem:[%s1105_s3] sm:$0xff]  ;;  %818 = vmatprep.subr.mxu0 %v258_v0  ;;  %s760_s26 = sshll.u32 %s1109_s24, 3  ;;  %s762_s30 = sshll.u32 %s1111_s25, 3 }
   0xd   : > { %858 = vmatprep.subr.mxu1 %v413_v1  ;;  %819 = vmatpush3.msra.mxu0 %v258_v0  ;;  %s925_s29 = scalar_lea.vmem %s1102_s0, %s760_s26  ;;  %s934_s8 = scalar_lea.vmem %s1103_s1, %s762_s30  ;;  %v986_v26 = vld [vmem:[%s1106_s4] ss:$0 sm:$0xff] }
   0xe   : > { %859 = vmatpush3.msra.mxu1 %v413_v1  ;;  %832 = vmatprep.subr.mxu0 %v413_v1  ;;  %v250_v2 = vld [vmem:[%s925_s29] sm:$0xff]  ;;  %v251_v3 = vld [vmem:[%s925_s29 + $0x8] sm:$0xff]  ;;  %v252_v4 = vld [vmem:[%s925_s29 + $0x10] sm:$0xff]  ;;  %s993_s13 = scalar_lea.vmem %s1107_s5, %s762_s30 }
   0xf   : > { %820 = vmatprep.mubr.msk.f32.mxu0 %vm259_vm0, %v250_v2  ;;  %v401_v5 = vld [vmem:[%s934_s8 + $0x20] sm:$0xff]  ;;  %v402_v6 = vld [vmem:[%s934_s8 + $0x28] sm:$0xff]  ;;  %v403_v7 = vld [vmem:[%s934_s8 + $0x30] sm:$0xff] }
  0x10   : > { %840 = vmatprep.mubr.msk.f32.mxu1 %vm259_vm0, %v401_v5  ;;  %821 = vmatmul.mubr.msk.f32.vlgmr.msra.gmra.mxu0 %vm259_vm0, %v251_v3  ;;  %v253_v8 = vld [vmem:[%s925_s29 + $0x18] sm:$0xff]  ;;  %v254_v10 = vld [vmem:[%s925_s29 + $0x20] sm:$0xff]  ;;  %v255_v12 = vld [vmem:[%s925_s29 + $0x28] sm:$0xff] }
  0x11   : > { %833 = vmatpush3.msra.mxu0 %v413_v1  ;;  %841 = vmatmul.mubr.msk.f32.vlgmr.msra.gmra.mxu1 %vm259_vm0, %v402_v6  ;;  %v404_v9 = vld [vmem:[%s934_s8 + $0x38] sm:$0xff]  ;;  %v405_v11 = vld [vmem:[%s934_s8 + $0x40] sm:$0xff]  ;;  %v406_v13 = vld [vmem:[%s934_s8 + $0x48] sm:$0xff] }
  0x12   : > { %823 = vmatprep.mubr.msk.f32.mxu0 %vm259_vm0, %v252_v4  ;;  %843 = vmatprep.mubr.msk.f32.mxu1 %vm259_vm0, %v403_v7  ;;  %v256_v14 = vld [vmem:[%s925_s29 + $0x30] sm:$0xff]  ;;  %v257_v16 = vld [vmem:[%s925_s29 + $0x38] sm:$0xff]  ;;  %v397_v18 = vld [vmem:[%s934_s8] sm:$0xff] }
  0x13   : > { %v407_v15 = vld [vmem:[%s934_s8 + $0x50] sm:$0xff]  ;;  %v408_v17 = vld [vmem:[%s934_s8 + $0x58] sm:$0xff]  ;;  %v409_v19 = vld [vmem:[%s934_s8 + $0x60] sm:$0xff] }
  0x14   : > { %824 = vmatmul.mubr.msk.f32.gmra.mxu0 %vm259_vm0, %v253_v8  ;;  %v398_v20 = vld [vmem:[%s934_s8 + $0x8] sm:$0xff]  ;;  %v399_v22 = vld [vmem:[%s934_s8 + $0x10] sm:$0xff]  ;;  %v400_v24 = vld [vmem:[%s934_s8 + $0x18] sm:$0xff] }
  0x15   : > { %844 = vmatmul.mubr.msk.f32.gmra.mxu1 %vm259_vm0, %v404_v9  ;;  %826 = vmatprep.mubr.msk.f32.mxu0 %vm259_vm0, %v254_v10  ;;  %v410_v21 = vld [vmem:[%s934_s8 + $0x68] sm:$0xff]  ;;  %v411_v23 = vld [vmem:[%s934_s8 + $0x70] sm:$0xff]  ;;  %v412_v25 = vld [vmem:[%s934_s8 + $0x78] sm:$0xff] }
  0x16   : > { %846 = vmatprep.mubr.msk.f32.mxu1 %vm259_vm0, %v405_v11 }
  0x18   : > { %827 = vmatmul.mubr.msk.f32.gmra.mxu0 %vm259_vm0, %v255_v12 }
  0x19   : > { %847 = vmatmul.mubr.msk.f32.gmra.mxu1 %vm259_vm0, %v406_v13  ;;  %829 = vmatprep.mubr.msk.f32.mxu0 %vm259_vm0, %v256_v14 }
  0x1a   : > { %849 = vmatprep.mubr.msk.f32.mxu1 %vm259_vm0, %v407_v15 }
  0x1c   : > { %830 = vmatmul.mubr.msk.f32.gmra.mxu0 %vm259_vm0, %v257_v16 }
  0x1d   : > { %850 = vmatmul.mubr.msk.f32.gmra.mxu1 %vm259_vm0, %v408_v17  ;;  %834 = vmatprep.mubr.msk.f32.mxu0 %vm259_vm0, %v397_v18 }
  0x1e   : > { %852 = vmatprep.mubr.msk.f32.mxu1 %vm259_vm0, %v409_v19 }
  0x20   : > { %835 = vmatmul.mubr.msk.f32.vlgmr.msra.gmra.mxu0 %vm259_vm0, %v398_v20 }
  0x21   : > { %853 = vmatmul.mubr.msk.f32.gmra.mxu1 %vm259_vm0, %v410_v21  ;;  %837 = vmatprep.mubr.msk.f32.mxu0 %vm259_vm0, %v399_v22 }
  0x22   : > { %855 = vmatprep.mubr.msk.f32.mxu1 %vm259_vm0, %v411_v23 }
  0x24   : > { %838 = vmatmul.mubr.msk.f32.gmra.mxu0 %vm259_vm0, %v400_v24 }
  0x25   : > { %856 = vmatmul.mubr.msk.f32.gmra.mxu1 %vm259_vm0, %v412_v25 }
  0xd0   : > { %v822_v27 = vpop.f32.mrf.mxu0 }
  0xd1   : > { %390 = vst.msk [vmem:[#allocation2 + $0x8] sm:$0xff] %vm259_vm0, %v822_v27  ;;  %v842_v28 = vpop.f32.mrf.mxu1 }
  0xd2   : > { %v561_v29 = vadd.f32 %v842_v28, %v986_v26  ;;  %v350_v30 = vpop.f32.mrf.mxu0 }
  0xd3   : > { %389 = vst.msk [vmem:[#allocation2] sm:$0xff] %vm259_vm0, %v350_v30  ;;  %v555_v31 = vpop.f32.mrf.mxu1 }
  0xd4   : > { %619 = vst.msk [vmem:[%s993_s13 + $0x28] sm:$0xff] %vm259_vm0, %v561_v29  ;;  %v556_v32 = vadd.f32 %v986_v26, %v555_v31  ;;  %v825_v33 = vpop.f32.mrf.mxu0 }
  0xd5   : > { %392 = vst.msk [vmem:[#allocation2 + $0x18] sm:$0xff] %vm259_vm0, %v825_v33  ;;  %v845_v34 = vpop.f32.mrf.mxu1 }
  0xd6   : > { %618 = vst.msk [vmem:[%s993_s13 + $0x20] sm:$0xff] %vm259_vm0, %v556_v32  ;;  %v571_v35 = vadd.f32 %v845_v34, %v986_v26  ;;  %v360_v36 = vpop.f32.mrf.mxu0 }
  0xd7   : > { %391 = vst.msk [vmem:[#allocation2 + $0x10] sm:$0xff] %vm259_vm0, %v360_v36  ;;  %v565_v37 = vpop.f32.mrf.mxu1 }
  0xd8   : > { %621 = vst.msk [vmem:[%s993_s13 + $0x38] sm:$0xff] %vm259_vm0, %v571_v35  ;;  %v566_v38 = vadd.f32 %v986_v26, %v565_v37  ;;  %v828_v39 = vpop.f32.mrf.mxu0  ;;  %v637_v33 = vld [vmem:[#allocation2 + $0x8] sm:$0xff] }
  0xd9   : > { %394 = vst.msk [vmem:[#allocation2 + $0x28] sm:$0xff] %vm259_vm0, %v828_v39  ;;  %v848_v40 = vpop.f32.mrf.mxu1 }
  0xda   : > { %620 = vst.msk [vmem:[%s993_s13 + $0x30] sm:$0xff] %vm259_vm0, %v566_v38  ;;  %v581_v41 = vadd.f32 %v848_v40, %v986_v26  ;;  %v370_v42 = vpop.f32.mrf.mxu0  ;;  %v630_v23 = vld [vmem:[#allocation2] sm:$0xff] }
  0xdb   : > { %393 = vst.msk [vmem:[#allocation2 + $0x20] sm:$0xff] %vm259_vm0, %v370_v42  ;;  %v575_v43 = vpop.f32.mrf.mxu1  ;;  %v646_v49 = vld [vmem:[%s993_s13 + $0x28] sm:$0xff] }
  0xdc   : > { %623 = vst.msk [vmem:[%s993_s13 + $0x48] sm:$0xff] %vm259_vm0, %v581_v41  ;;  %v576_v44 = vadd.f32 %v986_v26, %v575_v43  ;;  %v831_v45 = vpop.f32.mrf.mxu0  ;;  %v651_v52 = vld [vmem:[#allocation2 + $0x18] sm:$0xff] }
  0xdd   : > { %396 = vst.msk [vmem:[#allocation2 + $0x38] sm:$0xff] %vm259_vm0, %v831_v45  ;;  %v851_v46 = vpop.f32.mrf.mxu1  ;;  %v645_v48 = vld [vmem:[%s993_s13 + $0x20] sm:$0xff] }
  0xde   : > { %v644_v47 = vld [vmem:[#allocation2 + $0x10] sm:$0xff]  ;;  %622 = vst.msk [vmem:[%s993_s13 + $0x40] sm:$0xff] %vm259_vm0, %v576_v44  ;;  %v591_v50 = vadd.f32 %v851_v46, %v986_v26  ;;  %v380_v51 = vpop.f32.mrf.mxu0 }
  0xdf   : > { %v653_v53 = vld [vmem:[%s993_s13 + $0x38] sm:$0xff]  ;;  %v647_v54 = vadd.f32 %v645_v48, %v644_v47  ;;  %v648_v55 = vadd.f32 %v646_v49, %v644_v47  ;;  %395 = vst.msk [vmem:[#allocation2 + $0x30] sm:$0xff] %vm259_vm0, %v380_v51  ;;  %v585_v56 = vpop.f32.mrf.mxu1 }
  0xe0   : > { %v655_v57 = vadd.f32 %v653_v53, %v651_v52  ;;  %625 = vst.msk [vmem:[%s993_s13 + $0x58] sm:$0xff] %vm259_vm0, %v591_v50  ;;  %v586_v58 = vadd.f32 %v986_v26, %v585_v56  ;;  %v836_v59 = vpop.f32.mrf.mxu0  ;;  %v665_v15 = vld [vmem:[#allocation2 + $0x28] sm:$0xff] }
  0xe1   : > { %649 = vst.msk [vmem:[%s993_s13 + $0x20] sm:$0xff] %vm259_vm0, %v647_v54  ;;  %650 = vst.msk [vmem:[%s993_s13 + $0x28] sm:$0xff] %vm259_vm0, %v648_v55  ;;  %v652_v60 = vld [vmem:[%s993_s13 + $0x30] sm:$0xff]  ;;  %v541_v61 = vadd.f32 %v836_v59, %v986_v26  ;;  %v854_v62 = vpop.f32.mrf.mxu1 }
  0xe2   : > { %657 = vst.msk [vmem:[%s993_s13 + $0x38] sm:$0xff] %vm259_vm0, %v655_v57  ;;  %v654_v63 = vadd.f32 %v652_v60, %v651_v52  ;;  %v658_v0 = vld [vmem:[#allocation2 + $0x20] sm:$0xff]  ;;  %624 = vst.msk [vmem:[%s993_s13 + $0x50] sm:$0xff] %vm259_vm0, %v586_v58  ;;  %v601_v1 = vadd.f32 %v854_v62, %v986_v26  ;;  %v535_v2 = vpop.f32.mrf.mxu0 }
  0xe3   : > { %v660_v3 = vld [vmem:[%s993_s13 + $0x48] sm:$0xff]  ;;  %615 = vst.msk [vmem:[%s993_s13 + $0x8] sm:$0xff] %vm259_vm0, %v541_v61  ;;  %v536_v4 = vadd.f32 %v986_v26, %v535_v2  ;;  %v595_v5 = vpop.f32.mrf.mxu1 }
  0xe4   : > { %656 = vst.msk [vmem:[%s993_s13 + $0x30] sm:$0xff] %vm259_vm0, %v654_v63  ;;  %v662_v6 = vadd.f32 %v660_v3, %v658_v0  ;;  %627 = vst.msk [vmem:[%s993_s13 + $0x68] sm:$0xff] %vm259_vm0, %v601_v1  ;;  %v596_v7 = vadd.f32 %v986_v26, %v595_v5  ;;  %v839_v8 = vpop.f32.mrf.mxu0  ;;  %v679_v36 = vld [vmem:[#allocation2 + $0x38] sm:$0xff] }
  0xe5   : > { %v659_v9 = vld [vmem:[%s993_s13 + $0x40] sm:$0xff]  ;;  %614 = vst.msk [vmem:[%s993_s13] sm:$0xff] %vm259_vm0, %v536_v4  ;;  %v551_v10 = vadd.f32 %v839_v8, %v986_v26  ;;  %v857_v11 = vpop.f32.mrf.mxu1 }
  0xe6   : > { %v661_v12 = vadd.f32 %v659_v9, %v658_v0  ;;  %664 = vst.msk [vmem:[%s993_s13 + $0x48] sm:$0xff] %vm259_vm0, %v662_v6  ;;  %626 = vst.msk [vmem:[%s993_s13 + $0x60] sm:$0xff] %vm259_vm0, %v596_v7  ;;  %v611_v13 = vadd.f32 %v857_v11, %v986_v26  ;;  %v545_v14 = vpop.f32.mrf.mxu0  ;;  %v672_v27 = vld [vmem:[#allocation2 + $0x30] sm:$0xff] }
  0xe7   : > { %v667_v16 = vld [vmem:[%s993_s13 + $0x58] sm:$0xff]  ;;  %617 = vst.msk [vmem:[%s993_s13 + $0x18] sm:$0xff] %vm259_vm0, %v551_v10  ;;  %v546_v17 = vadd.f32 %v986_v26, %v545_v14  ;;  %v605_v18 = vpop.f32.mrf.mxu1 }
  0xe8   : > { %663 = vst.msk [vmem:[%s993_s13 + $0x40] sm:$0xff] %vm259_vm0, %v661_v12  ;;  %v669_v19 = vadd.f32 %v667_v16, %v665_v15  ;;  %629 = vst.msk [vmem:[%s993_s13 + $0x78] sm:$0xff] %vm259_vm0, %v611_v13  ;;  %v606_v20 = vadd.f32 %v986_v26, %v605_v18 }
  0xe9   : > { %v666_v21 = vld [vmem:[%s993_s13 + $0x50] sm:$0xff]  ;;  %616 = vst.msk [vmem:[%s993_s13 + $0x10] sm:$0xff] %vm259_vm0, %v546_v17 }
  0xea   : > { %671 = vst.msk [vmem:[%s993_s13 + $0x58] sm:$0xff] %vm259_vm0, %v669_v19  ;;  %v668_v22 = vadd.f32 %v666_v21, %v665_v15  ;;  %v632_v24 = vld [vmem:[%s993_s13 + $0x8] sm:$0xff]  ;;  %628 = vst.msk [vmem:[%s993_s13 + $0x70] sm:$0xff] %vm259_vm0, %v606_v20 }
  0xeb   : > { %v634_v25 = vadd.f32 %v632_v24, %v630_v23  ;;  %v674_v28 = vld [vmem:[%s993_s13 + $0x68] sm:$0xff] }
  0xec   : > { %670 = vst.msk [vmem:[%s993_s13 + $0x50] sm:$0xff] %vm259_vm0, %v668_v22  ;;  %v676_v26 = vadd.f32 %v674_v28, %v672_v27  ;;  %v631_v29 = vld [vmem:[%s993_s13] sm:$0xff] }
  0xed   : > { %636 = vst.msk [vmem:[%s993_s13 + $0x8] sm:$0xff] %vm259_vm0, %v634_v25  ;;  %v633_v30 = vadd.f32 %v631_v29, %v630_v23  ;;  %v673_v31 = vld [vmem:[%s993_s13 + $0x60] sm:$0xff] }
  0xee   : > { %678 = vst.msk [vmem:[%s993_s13 + $0x68] sm:$0xff] %vm259_vm0, %v676_v26  ;;  %v675_v32 = vadd.f32 %v673_v31, %v672_v27  ;;  %v639_v34 = vld [vmem:[%s993_s13 + $0x18] sm:$0xff] }
  0xef   : > { %635 = vst.msk [vmem:[%s993_s13] sm:$0xff] %vm259_vm0, %v633_v30  ;;  %v641_v35 = vadd.f32 %v639_v34, %v637_v33  ;;  %v681_v37 = vld [vmem:[%s993_s13 + $0x78] sm:$0xff] }
  0xf0   : > { %677 = vst.msk [vmem:[%s993_s13 + $0x60] sm:$0xff] %vm259_vm0, %v675_v32  ;;  %v683_v38 = vadd.f32 %v681_v37, %v679_v36  ;;  %v638_v39 = vld [vmem:[%s993_s13 + $0x10] sm:$0xff] }
  0xf1   : > { %643 = vst.msk [vmem:[%s993_s13 + $0x18] sm:$0xff] %vm259_vm0, %v641_v35  ;;  %v640_v40 = vadd.f32 %v638_v39, %v637_v33  ;;  %v680_v41 = vld [vmem:[%s993_s13 + $0x70] sm:$0xff] }
  0xf2   : > { %685 = vst.msk [vmem:[%s993_s13 + $0x78] sm:$0xff] %vm259_vm0, %v683_v38  ;;  %v682_v42 = vadd.f32 %v680_v41, %v679_v36 }
  0xf3   : > { %642 = vst.msk [vmem:[%s993_s13 + $0x10] sm:$0xff] %vm259_vm0, %v640_v40 }
  0xf4   : > { %684 = vst.msk [vmem:[%s993_s13 + $0x70] sm:$0xff] %vm259_vm0, %v682_v42 }
  0xf5 PF: > { %s15_s18 = sadd.s32 1, %s874_s18  }
  0xf6   : > { %p12_p5 = scmp.ge.s32.totalorder %s15_s18, 4  }
  0xf8   :  { %14 = sbr.rel (!%p12_p5) target bundleno = 1 (0x1), region = 73 }

</bundles_post_ra>
